<compile_context>
chip_gen: v7x
topology: tpu7x:2x2x1
jax: 0.10.0
libtpu: 0.0.40
codegen_flags: <defaults>
</compile_context>

<pallas_src>
import functools

import jax
import jax.numpy as jnp
from jax.experimental import pallas as pl
from jax.experimental.pallas import tpu as pltpu

_LANE = 128      # last-dim (lane) tile width
_SUBLANE = 8     # second-to-last-dim (sublane) tile width


def _round_up(x, m):
    return ((x + m - 1) // m) * m


def _mlp_kernel(x_ref, w1_ref, b1_ref, w2_ref, b2_ref, out_ref):
    # fc1 + ReLU (MXU matmul, f32 accumulation).  All shapes are lane/sublane
    # padded by the wrapper, so no masked ops or cross-lane repacks here.
    h = jnp.dot(x_ref[...], w1_ref[...], preferred_element_type=jnp.float32)
    h = jnp.maximum(h + b1_ref[...], 0.0)          # (Bp,Hp) + (1,Hp) broadcast
    # fc2
    q = jnp.dot(h, w2_ref[...], preferred_element_type=jnp.float32)
    out_ref[...] = (q + b2_ref[...]).astype(out_ref.dtype)


@jax.jit
def network_forward(state, w1, b1, w2, b2):
    """state: (B, input_size) f32. Returns q_values: (B, nb_action) f32."""
    B, in_f = state.shape
    hidden = w1.shape[1]
    nb_action = w2.shape[1]

    # Pad to lane/sublane-friendly sizes (zeros; mathematically inert).
    Bp = _round_up(B, _SUBLANE)
    Ip = _round_up(in_f, _LANE)
    Hp = _round_up(hidden, _LANE)
    Ap = _round_up(nb_action, _LANE)

    x_p = jnp.zeros((Bp, Ip), jnp.float32).at[:B, :in_f].set(state)
    w1_p = jnp.zeros((Ip, Hp), jnp.float32).at[:in_f, :hidden].set(w1)
    b1_p = jnp.zeros((1, Hp), jnp.float32).at[:, :hidden].set(b1)
    w2_p = jnp.zeros((Hp, Ap), jnp.float32).at[:hidden, :nb_action].set(w2)
    b2_p = jnp.zeros((1, Ap), jnp.float32).at[:, :nb_action].set(b2)

    flops = 2 * Bp * (Ip * Hp + Hp * Ap)
    bytes_accessed = 4 * (
        x_p.size + w1_p.size + b1_p.size + w2_p.size + b2_p.size + Bp * Ap
    )

    # No grid: single invocation, whole operands resident in VMEM (a few KB).
    # TODO(synk): if B ever grows to thousands of rows, add a batch grid axis
    # tiled at (512-1024, features) marked "parallel" so v7x's 2 TCs split it.
    q_pad = pl.pallas_call(
        _mlp_kernel,
        out_shape=jax.ShapeDtypeStruct((Bp, Ap), jnp.float32),
        in_specs=[pl.BlockSpec(memory_space=pltpu.MemorySpace.VMEM)] * 5,
        out_specs=pl.BlockSpec(memory_space=pltpu.MemorySpace.VMEM),
        cost_estimate=pl.CostEstimate(
            flops=flops, transcendentals=0, bytes_accessed=bytes_accessed
        ),
    )(x_p, w1_p, b1_p, w2_p, b2_p)

    # Slice the real (B, nb_action) block out in plain JAX.
    return q_pad[:B, :nb_action]


def init_params(key, input_size, nb_action, hidden=30):
    """Deterministic init mimicking nn.Linear default (uniform +/- 1/sqrt(fan_in))."""
    k1, k2, k3, k4 = jax.random.split(key, 4)
    bound1 = 1.0 / jnp.sqrt(input_size)
    bound2 = 1.0 / jnp.sqrt(hidden)
    w1 = jax.random.uniform(k1, (input_size, hidden), jnp.float32, -bound1, bound1)
    b1 = jax.random.uniform(k2, (1, hidden), jnp.float32, -bound1, bound1)
    w2 = jax.random.uniform(k3, (hidden, nb_action), jnp.float32, -bound2, bound2)
    b2 = jax.random.uniform(k4, (1, nb_action), jnp.float32, -bound2, bound2)
    return w1, b1, w2, b2


if __name__ == "__main__":
    key = jax.random.PRNGKey(0)
    batch = 8          # amortize the call: one pallas_call for the whole batch
    input_size = 5     # self-driving car: 3 sensor signals + 2 orientation
    nb_action = 3

    k_params, k_state = jax.random.split(key)
    w1, b1, w2, b2 = init_params(k_params, input_size, nb_action)
    state = jax.random.normal(k_state, (batch, input_size), jnp.float32)

    q = network_forward(state, w1, b1, w2, b2)
    q = jax.block_until_ready(q)

    # Pure-JAX reference check.
    ref = jnp.maximum(state @ w1 + b1, 0.0) @ w2 + b2
    assert q.shape == (batch, nb_action)
    assert jnp.allclose(q, ref, atol=1e-5, rtol=1e-5)

    # Also check a non-multiple-of-8 batch (action-selection path, B=1).
    q1 = jax.block_until_ready(network_forward(state[:1], w1, b1, w2, b2))
    ref1 = jnp.maximum(state[:1] @ w1 + b1, 0.0) @ w2 + b2
    assert q1.shape == (1, nb_action)
    assert jnp.allclose(q1, ref1, atol=1e-5, rtol=1e-5)

    print("KERNEL_OK")
</pallas_src>

<mosaic_0001>
module attributes {stable_mosaic.version = 11 : i64} {
  func.func @_mlp_kernel(%arg0: memref<8x128xf32, #tpu.memory_space<vmem>>, %arg1: memref<128x128xf32, #tpu.memory_space<vmem>>, %arg2: memref<1x128xf32, #tpu.memory_space<vmem>>, %arg3: memref<128x128xf32, #tpu.memory_space<vmem>>, %arg4: memref<1x128xf32, #tpu.memory_space<vmem>>, %arg5: memref<8x128xf32, #tpu.memory_space<vmem>>) attributes {dimension_semantics = [], scalar_prefetch = 0 : i64, scratch_operands = 0 : i64, tpu.core_type = #tpu.core_type<tc>} {
    %c0 = arith.constant 0 : index
    %c0_0 = arith.constant 0 : index
    %0 = vector.load %arg0[%c0, %c0_0] : memref<8x128xf32, #tpu.memory_space<vmem>>, vector<8x128xf32>
    %c0_1 = arith.constant 0 : index
    %c0_2 = arith.constant 0 : index
    %1 = vector.load %arg1[%c0_1, %c0_2] : memref<128x128xf32, #tpu.memory_space<vmem>>, vector<128x128xf32>
    %cst = arith.constant dense<0.000000e+00> : vector<8x128xf32>
    %2 = tpu.matmul %0, %1, %cst {dimension_numbers = #tpu.dot_dimension_numbers<[1], [0], [0], [1], [0, 0, 1, 1], [], []>} : vector<8x128xf32>, vector<128x128xf32>, vector<8x128xf32> -> vector<8x128xf32>
    %c0_3 = arith.constant 0 : index
    %c0_4 = arith.constant 0 : index
    %3 = vector.load %arg2[%c0_3, %c0_4] : memref<1x128xf32, #tpu.memory_space<vmem>>, vector<1x128xf32>
    %4 = vector.broadcast %3 : vector<1x128xf32> to vector<8x128xf32>
    %5 = arith.addf %2, %4 : vector<8x128xf32>
    %cst_5 = arith.constant 0.000000e+00 : f32
    %6 = vector.broadcast %cst_5 : f32 to vector<8x128xf32>
    %7 = arith.maximumf %5, %6 : vector<8x128xf32>
    %c0_6 = arith.constant 0 : index
    %c0_7 = arith.constant 0 : index
    %8 = vector.load %arg3[%c0_6, %c0_7] : memref<128x128xf32, #tpu.memory_space<vmem>>, vector<128x128xf32>
    %cst_8 = arith.constant dense<0.000000e+00> : vector<8x128xf32>
    %9 = tpu.matmul %7, %8, %cst_8 {dimension_numbers = #tpu.dot_dimension_numbers<[1], [0], [0], [1], [0, 0, 1, 1], [], []>} : vector<8x128xf32>, vector<128x128xf32>, vector<8x128xf32> -> vector<8x128xf32>
    %c0_9 = arith.constant 0 : index
    %c0_10 = arith.constant 0 : index
    %10 = vector.load %arg4[%c0_9, %c0_10] : memref<1x128xf32, #tpu.memory_space<vmem>>, vector<1x128xf32>
    %11 = vector.broadcast %10 : vector<1x128xf32> to vector<8x128xf32>
    %12 = arith.addf %9, %11 : vector<8x128xf32>
    %c0_11 = arith.constant 0 : index
    %c0_12 = arith.constant 0 : index
    %13 = vector.load %arg5[%c0_11, %c0_12] : memref<8x128xf32, #tpu.memory_space<vmem>>, vector<8x128xf32>
    tpu.vector_store %arg5[%c0_11, %c0_12], %12 {strides = array<i32>} : memref<8x128xf32, #tpu.memory_space<vmem>>, vector<8x128xf32>,
    return
  }
}

</mosaic_0001>

<bundles_post_ra>
// kernel: network_forward.1
= control target key start
LH: loop header
LB: loop body
LE: loop exit
PB: predicated region body
PF: predicated region fallthrough
CT: control target
= control target key end

     0   :  { %v370_v0 = vmov 0.0|0.0   ;;  %vm371_vm0 = vmmov 0   ;;  %v372_v4 = vmov 0.0   ;;  %s527_s1 = inlined_call_operand.vmem [shape: f32[128,128], index: 1, kind: input, shape index: {}]   ;;  %s528_s3 = inlined_call_operand.vmem [shape: f32[128,128], index: 3, kind: input, shape index: {}]   ;;  %s529_s0 = inlined_call_operand.vmem [shape: f32[8,128], index: 0, kind: input, shape index: {}]   ;;  %s530_s2 = inlined_call_operand.vmem [shape: f32[1,128], index: 2, kind: input, shape index: {}]   ;;  %s531_s4 = inlined_call_operand.vmem [shape: f32[1,128], index: 4, kind: input, shape index: {}]   ;;  %s532_s5 = inlined_call_operand.vmem [shape: f32[8,128], index: 5, kind: output, shape index: {}]  }
   0x1   :  { %319 = vmatprep.subr.bf16.mxu0 %v370_v0  ;;  %v21_v1 = vld [vmem:[%s527_s1] sm:$0xff]  ;;  %v22_v2 = vld [vmem:[%s527_s1 + $0x8] sm:$0xff]  ;;  %v23_v3 = vld [vmem:[%s527_s1 + $0x10] sm:$0xff]  ;;  %281 = vmatprep.mubr.msk.f32.mxu0 %vm371_vm0, %v372_v4 }
   0x2   :  { %v320_v5 = vpack.c.bf16 %v22_v2, %v21_v1  ;;  %v24_v6 = vld [vmem:[%s527_s1 + $0x18] sm:$0xff]  ;;  %343 = vmatprep.subr.bf16.mxu1 %v370_v0  ;;  %316 = vmatprep.mubr.msk.f32.mxu1 %vm371_vm0, %v372_v4  ;;  %v25_v8 = vld [vmem:[%s527_s1 + $0x20] sm:$0xff]  ;;  %v26_v9 = vld [vmem:[%s527_s1 + $0x28] sm:$0xff] }
   0x3   :  { %v323_v7 = vpack.c.bf16 %v24_v6, %v23_v3  ;;  %v115_v10 = vld [vmem:[%s528_s3] sm:$0xff]  ;;  %v116_v11 = vld [vmem:[%s528_s3 + $0x8] sm:$0xff]  ;;  %v117_v12 = vld [vmem:[%s528_s3 + $0x10] sm:$0xff]  ;;  %v326_v14 = vpack.c.bf16 %v26_v9, %v25_v8 }
   0x4   :  { %321 = vmatpush3.bf16.msra.mxu0 %v320_v5  ;;  %v118_v13 = vld [vmem:[%s528_s3 + $0x18] sm:$0xff]  ;;  %v344_v15 = vpack.c.bf16 %v116_v11, %v115_v10  ;;  %v27_v16 = vld [vmem:[%s527_s1 + $0x30] sm:$0xff]  ;;  %v119_v19 = vld [vmem:[%s528_s3 + $0x20] sm:$0xff] }
   0x5   :  { %322 = vmatprep.subr.bf16.mxu0 %v370_v0  ;;  %v28_v17 = vld [vmem:[%s527_s1 + $0x38] sm:$0xff]  ;;  %v347_v18 = vpack.c.bf16 %v118_v13, %v117_v12  ;;  %v120_v20 = vld [vmem:[%s528_s3 + $0x28] sm:$0xff]  ;;  %v29_v22 = vld [vmem:[%s527_s1 + $0x40] sm:$0xff] }
   0x6   :  { %345 = vmatpush3.bf16.msra.mxu1 %v344_v15  ;;  %v329_v21 = vpack.c.bf16 %v28_v17, %v27_v16  ;;  %v30_v23 = vld [vmem:[%s527_s1 + $0x48] sm:$0xff]  ;;  %v350_v24 = vpack.c.bf16 %v120_v20, %v119_v19  ;;  %v121_v25 = vld [vmem:[%s528_s3 + $0x30] sm:$0xff]  ;;  %v122_v26 = vld [vmem:[%s528_s3 + $0x38] sm:$0xff] }
   0x7   :  { %346 = vmatprep.subr.bf16.mxu1 %v370_v0  ;;  %v332_v27 = vpack.c.bf16 %v30_v23, %v29_v22  ;;  %v31_v28 = vld [vmem:[%s527_s1 + $0x50] sm:$0xff]  ;;  %v32_v29 = vld [vmem:[%s527_s1 + $0x58] sm:$0xff]  ;;  %v353_v30 = vpack.c.bf16 %v122_v26, %v121_v25  ;;  %v123_v31 = vld [vmem:[%s528_s3 + $0x40] sm:$0xff] }
   0x8   :  { %324 = vmatpush3.bf16.msra.mxu0 %v323_v7  ;;  %v124_v32 = vld [vmem:[%s528_s3 + $0x48] sm:$0xff]  ;;  %v335_v33 = vpack.c.bf16 %v32_v29, %v31_v28  ;;  %v33_v34 = vld [vmem:[%s527_s1 + $0x60] sm:$0xff]  ;;  %v125_v37 = vld [vmem:[%s528_s3 + $0x50] sm:$0xff] }
   0x9   :  { %325 = vmatprep.subr.bf16.mxu0 %v370_v0  ;;  %v34_v35 = vld [vmem:[%s527_s1 + $0x68] sm:$0xff]  ;;  %v356_v36 = vpack.c.bf16 %v124_v32, %v123_v31  ;;  %v126_v38 = vld [vmem:[%s528_s3 + $0x58] sm:$0xff]  ;;  %v35_v40 = vld [vmem:[%s527_s1 + $0x70] sm:$0xff] }
   0xa   :  { %348 = vmatpush3.bf16.msra.mxu1 %v347_v18  ;;  %v338_v39 = vpack.c.bf16 %v34_v35, %v33_v34  ;;  %v36_v41 = vld [vmem:[%s527_s1 + $0x78] sm:$0xff]  ;;  %v359_v42 = vpack.c.bf16 %v126_v38, %v125_v37  ;;  %v127_v43 = vld [vmem:[%s528_s3 + $0x60] sm:$0xff]  ;;  %v128_v44 = vld [vmem:[%s528_s3 + $0x68] sm:$0xff] }
   0xb   :  { %349 = vmatprep.subr.bf16.mxu1 %v370_v0  ;;  %v341_v45 = vpack.c.bf16 %v36_v41, %v35_v40  ;;  %v362_v46 = vpack.c.bf16 %v128_v44, %v127_v43  ;;  %v20_v47 = vld [vmem:[%s529_s0] sm:$0xff]  ;;  %v129_v48 = vld [vmem:[%s528_s3 + $0x70] sm:$0xff]  ;;  %v130_v49 = vld [vmem:[%s528_s3 + $0x78] sm:$0xff] }
   0xc   :  { %327 = vmatpush3.bf16.msra.mxu0 %v326_v14  ;;  %v365_v50 = vpack.c.bf16 %v130_v49, %v129_v48  ;;  %v213_v51 = vld [vmem:[%s530_s2] ss:$0 sm:$0xff] }
   0xd   :  { %328 = vmatprep.subr.bf16.mxu0 %v370_v0  ;;  %v214_v56 = vld [vmem:[%s531_s4] ss:$0 sm:$0xff] }
   0xe   :  { %351 = vmatpush3.bf16.msra.mxu1 %v350_v24 }
   0xf   :  { %352 = vmatprep.subr.bf16.mxu1 %v370_v0 }
  0x10   :  { %330 = vmatpush3.bf16.msra.mxu0 %v329_v21 }
  0x11   :  { %331 = vmatprep.subr.bf16.mxu0 %v370_v0 }
  0x12   :  { %354 = vmatpush3.bf16.msra.mxu1 %v353_v30 }
  0x13   :  { %355 = vmatprep.subr.bf16.mxu1 %v370_v0 }
  0x14   :  { %333 = vmatpush3.bf16.msra.mxu0 %v332_v27 }
  0x15   :  { %334 = vmatprep.subr.bf16.mxu0 %v370_v0 }
  0x16   :  { %357 = vmatpush3.bf16.msra.mxu1 %v356_v36 }
  0x17   :  { %358 = vmatprep.subr.bf16.mxu1 %v370_v0 }
  0x18   :  { %336 = vmatpush3.bf16.msra.mxu0 %v335_v33 }
  0x19   :  { %337 = vmatprep.subr.bf16.mxu0 %v370_v0 }
  0x1a   :  { %360 = vmatpush3.bf16.msra.mxu1 %v359_v42 }
  0x1b   :  { %361 = vmatprep.subr.bf16.mxu1 %v370_v0 }
  0x1c   :  { %339 = vmatpush3.bf16.msra.mxu0 %v338_v39 }
  0x1d   :  { %340 = vmatprep.subr.bf16.mxu0 %v370_v0 }
  0x1e   :  { %363 = vmatpush3.bf16.msra.mxu1 %v362_v46 }
  0x1f   :  { %364 = vmatprep.subr.bf16.mxu1 %v370_v0 }
  0x20   :  { %342 = vmatpush3.bf16.msra.mxu0 %v341_v45 }
  0x22   :  { %366 = vmatpush3.bf16.msra.mxu1 %v365_v50 }
  0x23   :  { %282 = vmatmul.mubr.f32.vlgmr.msra.gmra.mrb[0].mxu0 %v20_v47 }
  0xf6   :  { %v110_v52 = vpop.f32.mrb[0].mxu0 }
  0xf7   :  { %v111_v53 = vadd.f32 %v213_v51, %v110_v52  ;;  %v283_v54 = vpop.f32.mrb[1].mxu0 }
  0xf9   :  { %v114_v55 = vmax.f32 %v111_v53, 0.0 }
  0xfb   :  { %317 = vmatmul.mubr.f32.vlgmr.msra.gmra.mrb[0].mxu1 %v114_v55 }
 0x1ce   :  { %v204_v57 = vpop.f32.mrb[0].mxu1 }
 0x1cf   :  { %v205_v58 = vadd.f32 %v214_v56, %v204_v57  ;;  %v318_v59 = vpop.f32.mrb[1].mxu1 }
 0x1d1   :  { %208 = vst [vmem:[%s532_s5] sm:$0xff] %v205_v58 }

</bundles_post_ra>
